<compile_context>
chip_gen: v7x
topology: tpu7x:2x2x1
jax: 0.10.0
libtpu: 0.0.40
codegen_flags: <defaults>
</compile_context>

<pallas_src>
import functools

import jax
import jax.numpy as jnp
from jax.experimental import pallas as pl
from jax.experimental.pallas import tpu as pltpu


_DEFAULT_BLOCK_BYTES = 4 * 1024 * 1024   # ~4 MiB per tiled f32 input block
_DEFAULT_TARGET_LANE = 2048              # collapse trailing dims until >= this
_VMEM_LIMIT_BYTES = 32 * 1024 * 1024     # safe on v5e/v6e (128 MiB) and v7x (64 MiB)


# ---------------------------------------------------------------------------
# Elementwise math (numerically stable, transcendental-light)
# ---------------------------------------------------------------------------
def _focal_elementwise(x, t, pw, alpha, gamma):
    """Focal loss, f32, using log-sigmoid reformulation.

    log(sigmoid(x))  = min(x, 0)  - log1p(exp(-|x|))
    log(sigmoid(-x)) = min(-x, 0) - log1p(exp(-|x|))
    """
    z = jnp.exp(-jnp.abs(x))
    log1p_z = jnp.log1p(z)
    log_p = jnp.minimum(x, 0.0) - log1p_z        # log(sigmoid(x))
    log_1mp = jnp.minimum(-x, 0.0) - log1p_z     # log(sigmoid(-x))

    if gamma == 2.0:
        # Fast path: probs via one reciprocal, squares on the VPU.
        inv = 1.0 / (1.0 + z)
        pos = x >= 0.0
        pp = jnp.where(pos, inv, z * inv)        # sigmoid(x)
        pn = jnp.where(pos, z * inv, inv)        # sigmoid(-x)
        pow_pn = pn * pn
        pow_pp = pp * pp
    else:
        pow_pn = jnp.exp(gamma * log_1mp)        # sigmoid(-x) ** gamma
        pow_pp = jnp.exp(gamma * log_p)          # sigmoid(x)  ** gamma

    return (-alpha * pw * pow_pn * t * log_p
            - (1.0 - alpha) * pow_pp * (1.0 - t) * log_1mp)


# ---------------------------------------------------------------------------
# Kernels
# ---------------------------------------------------------------------------
def _focal_none_kernel(x_ref, t_ref, pw_ref, o_ref, *, alpha, gamma):
    x = x_ref[...].astype(jnp.float32)
    t = t_ref[...].astype(jnp.float32)
    pw = pw_ref[...].astype(jnp.float32)          # (1, lane) broadcasts over rows
    loss = _focal_elementwise(x, t, pw, alpha, gamma)
    o_ref[...] = loss.astype(o_ref.dtype)


def _focal_sum_kernel(x_ref, t_ref, pw_ref, o_ref, acc_ref, *,
                      alpha, gamma, rows_valid, tile_rows, tiles_per_core):
    c = pl.program_id(0)                 # megacore split ("parallel")
    i = pl.program_id(1)                 # reduction axis ("arbitrary")

    @pl.when(i == 0)
    def _():
        acc_ref[...] = jnp.zeros_like(acc_ref)

    x = x_ref[...].astype(jnp.float32)
    t = t_ref[...].astype(jnp.float32)
    pw = pw_ref[...].astype(jnp.float32)
    loss = _focal_elementwise(x, t, pw, alpha, gamma)

    # Mask rows past the valid extent (ragged last tile / clamped extra tiles).
    row0 = (c * tiles_per_core + i) * tile_rows
    row_ids = row0 + jax.lax.broadcasted_iota(jnp.int32, loss.shape, 0)
    loss = jnp.where(row_ids < rows_valid, loss, 0.0)

    # Pure VPU accumulation per step; one cross-lane reduce at the very end.
    acc_ref[...] += loss

    @pl.when(i == pl.num_programs(1) - 1)
    def _():
        o_ref[0, 0] = jnp.sum(acc_ref[...])


# ---------------------------------------------------------------------------
# Wrapper helpers
# ---------------------------------------------------------------------------
def _collapse_shape(shape, target_lane):
    """Collapse trailing dims into a lane-dense last axis."""
    total = 1
    for d in shape:
        total *= d
    lane = 1
    for d in reversed(shape):
        if lane >= target_lane:
            break
        lane *= d
    lane = max(lane, 1)
    rows = total // lane
    return rows, lane, total


def _row_tile(rows, lane, block_bytes):
    """Largest row tile (multiple of 8, or full extent) within the byte budget."""
    target = max(1, block_bytes // max(1, lane * 4))      # budget in f32
    if target >= rows:
        return rows                                       # single full-extent block
    t = max(8, (target // 8) * 8)
    return min(t, rows)


# ---------------------------------------------------------------------------
# Public API
# ---------------------------------------------------------------------------
def binary_focal_loss_with_logits(inputs, target, alpha=0.25, gamma=2.0,
                                  reduction="none", eps=None, pos_weight=None,
                                  block_bytes=_DEFAULT_BLOCK_BYTES,
                                  target_lane=_DEFAULT_TARGET_LANE):
    del eps  # deprecated in the reference, unused
    orig_shape = inputs.shape
    orig_dtype = inputs.dtype
    L = orig_shape[-1]

    rows, lane, total = _collapse_shape(orig_shape, target_lane)

    if pos_weight is None:
        pw_lane = jnp.ones((1, lane), dtype=jnp.float32)
    else:
        pw = jnp.asarray(pos_weight).astype(jnp.float32).reshape(1, L)
        pw_lane = jnp.tile(pw, (1, lane // L))

    x2 = inputs.reshape(rows, lane)
    # Cast targets to f32 (not to input dtype) so soft / integer labels are exact.
    t2 = target.astype(jnp.float32).reshape(rows, lane)

    tile_rows = _row_tile(rows, lane, block_bytes)
    n_tiles = (rows + tile_rows - 1) // tile_rows

    alpha = float(alpha)
    gamma = float(gamma)

    if reduction == "none":
        out = pl.pallas_call(
            functools.partial(_focal_none_kernel, alpha=alpha, gamma=gamma),
            out_shape=jax.ShapeDtypeStruct((rows, lane), orig_dtype),
            grid=(n_tiles,),
            in_specs=[
                pl.BlockSpec((tile_rows, lane), lambda i: (i, 0)),
                pl.BlockSpec((tile_rows, lane), lambda i: (i, 0)),
                pl.BlockSpec((1, lane), lambda i: (0, 0)),
            ],
            out_specs=pl.BlockSpec((tile_rows, lane), lambda i: (i, 0)),
            compiler_params=pltpu.CompilerParams(
                dimension_semantics=("parallel",),
                vmem_limit_bytes=_VMEM_LIMIT_BYTES),
        )(x2, t2, pw_lane)
        return out.reshape(orig_shape)

    if reduction in ("sum", "mean"):
        # Leading size-2 "parallel" axis -> megacore split on v7x; each core
        # gets its own scratch accumulator and its own output slot.
        tiles_per_core = (n_tiles + 1) // 2
        last_block = n_tiles - 1

        def row_map(c, i):
            blk = c * tiles_per_core + i
            return (jnp.minimum(blk, last_block), 0)   # clamp; extras are masked

        partials = pl.pallas_call(
            functools.partial(_focal_sum_kernel, alpha=alpha, gamma=gamma,
                              rows_valid=rows, tile_rows=tile_rows,
                              tiles_per_core=tiles_per_core),
            out_shape=jax.ShapeDtypeStruct((2, 1), jnp.float32),
            grid=(2, tiles_per_core),
            in_specs=[
                pl.BlockSpec((tile_rows, lane), row_map),
                pl.BlockSpec((tile_rows, lane), row_map),
                pl.BlockSpec((1, lane), lambda c, i: (0, 0)),
            ],
            out_specs=pl.BlockSpec((1, 1), lambda c, i: (c, 0),
                                   memory_space=pltpu.MemorySpace.SMEM),
            scratch_shapes=[pltpu.VMEM((tile_rows, lane), jnp.float32)],
            compiler_params=pltpu.CompilerParams(
                dimension_semantics=("parallel", "arbitrary"),
                vmem_limit_bytes=_VMEM_LIMIT_BYTES),
        )(x2, t2, pw_lane)

        total_loss = jnp.sum(partials)
        if reduction == "mean":
            total_loss = total_loss / jnp.float32(total)
        return total_loss.astype(orig_dtype)

    raise NotImplementedError(f"Invalid reduction mode: {reduction}")

# TODO(synk): extremely large single trailing dims (last dim >> 8192) would
# benefit from an additional lane-tiling grid axis; not needed for these shapes.


class BinaryFocalLossWithLogits:
    """JAX/Pallas port of the PyTorch module (forward pass only)."""

    def __init__(self, alpha, gamma=2.0, reduction="none", pos_weight=None):
        self.alpha = alpha
        self.gamma = gamma
        self.reduction = reduction
        self.pos_weight = pos_weight

    def __call__(self, inputs, target):
        return binary_focal_loss_with_logits(
            inputs, target, self.alpha, self.gamma, self.reduction,
            pos_weight=self.pos_weight)


# ---------------------------------------------------------------------------
# Reference (pure JAX, original naive formulation) for verification
# ---------------------------------------------------------------------------
def _ref_loss(inputs, target, alpha, gamma, reduction, pos_weight=None):
    if pos_weight is None:
        pos_weight = jnp.ones((inputs.shape[-1],), dtype=inputs.dtype)
    probs_pos = jax.nn.sigmoid(inputs)
    probs_neg = jax.nn.sigmoid(-inputs)
    loss = (-alpha * pos_weight * probs_neg ** gamma * target
            * jnp.log(probs_pos)
            - (1 - alpha) * probs_pos ** gamma * (1.0 - target)
            * jnp.log(probs_neg))
    if reduction == "none":
        return loss
    if reduction == "mean":
        return jnp.mean(loss)
    return jnp.sum(loss)


if __name__ == "__main__":
    key = jax.random.PRNGKey(0)
    k1, k2, k3, k4, k5 = jax.random.split(key, 5)

    # ---- test 1: NCHW-style input, explicit pos_weight, none + mean --------
    N, C, H, W = 2, 4, 16, 16
    x = jax.random.normal(k1, (N, C, H, W), dtype=jnp.float32) * 3.0
    tgt = jax.random.bernoulli(k2, 0.3, (N, C, H, W)).astype(jnp.float32)
    pos_weight = 0.5 + jax.random.uniform(k3, (W,), dtype=jnp.float32)

    loss_none = BinaryFocalLossWithLogits(alpha=0.25, gamma=2.0,
                                          reduction="none",
                                          pos_weight=pos_weight)
    out_none = jax.block_until_ready(loss_none(x, tgt))
    ref_none = _ref_loss(x, tgt, 0.25, 2.0, "none", pos_weight)
    assert out_none.shape == x.shape
    assert jnp.allclose(out_none, ref_none, atol=1e-5, rtol=1e-4)

    loss_mean = BinaryFocalLossWithLogits(alpha=0.25, gamma=2.0,
                                          reduction="mean",
                                          pos_weight=pos_weight)
    out_mean = jax.block_until_ready(loss_mean(x, tgt))
    ref_mean = _ref_loss(x, tgt, 0.25, 2.0, "mean", pos_weight)
    assert jnp.allclose(out_mean, ref_mean, atol=1e-5, rtol=1e-4)

    # ---- test 2: awkward shape, tiny tile budget to exercise ragged tiles,
    #              row masking and the clamped megacore blocks ---------------
    x3 = jax.random.normal(k4, (40, 2, 16), dtype=jnp.float32) * 2.0
    t3 = jax.random.bernoulli(k5, 0.4, (40, 2, 16)).astype(jnp.float32)

    out_sum = jax.block_until_ready(
        binary_focal_loss_with_logits(x3, t3, alpha=0.5, gamma=1.5,
                                      reduction="sum",
                                      block_bytes=2048, target_lane=32))
    ref_sum = _ref_loss(x3, t3, 0.5, 1.5, "sum")
    assert jnp.allclose(out_sum, ref_sum, atol=1e-3, rtol=1e-4)

    out_none3 = jax.block_until_ready(
        binary_focal_loss_with_logits(x3, t3, alpha=0.5, gamma=1.5,
                                      reduction="none",
                                      block_bytes=2048, target_lane=32))
    ref_none3 = _ref_loss(x3, t3, 0.5, 1.5, "none")
    assert out_none3.shape == x3.shape
    assert jnp.allclose(out_none3, ref_none3, atol=1e-5, rtol=1e-4)

    print("KERNEL_OK")
</pallas_src>

<mosaic_0001>
module attributes {stable_mosaic.version = 11 : i64} {
  func.func @_focal_none_kernel(%arg0: i32, %arg1: memref<1x2048xf32, #tpu.memory_space<vmem>>, %arg2: memref<1x2048xf32, #tpu.memory_space<vmem>>, %arg3: memref<1x2048xf32, #tpu.memory_space<vmem>>, %arg4: memref<1x2048xf32, #tpu.memory_space<vmem>>) attributes {dimension_semantics = [#tpu.dimension_semantics<parallel>], iteration_bounds = array<i64: 1>, scalar_prefetch = 0 : i64, scratch_operands = 0 : i64, tpu.core_type = #tpu.core_type<tc>, window_params = [{transform_indices = @transform_0, window_bounds = array<i64: 1, 2048>}, {transform_indices = @transform_1, window_bounds = array<i64: 1, 2048>}, {pipeline_mode = #tpu.pipeline_mode<synchronous>, transform_indices = @transform_2, window_bounds = array<i64: 1, 2048>}, {transform_indices = @transform_3, window_bounds = array<i64: 1, 2048>}]} {
    %c0 = arith.constant 0 : index
    %c0_0 = arith.constant 0 : index
    %0 = vector.load %arg1[%c0, %c0_0] : memref<1x2048xf32, #tpu.memory_space<vmem>>, vector<1x2048xf32>
    %c0_1 = arith.constant 0 : index
    %c0_2 = arith.constant 0 : index
    %1 = vector.load %arg2[%c0_1, %c0_2] : memref<1x2048xf32, #tpu.memory_space<vmem>>, vector<1x2048xf32>
    %c0_3 = arith.constant 0 : index
    %c0_4 = arith.constant 0 : index
    %2 = vector.load %arg3[%c0_3, %c0_4] : memref<1x2048xf32, #tpu.memory_space<vmem>>, vector<1x2048xf32>
    %3 = math.absf %0 : vector<1x2048xf32>
    %cst = arith.constant 0.000000e+00 : f32
    %4 = vector.broadcast %cst : f32 to vector<1x2048xf32>
    %5 = arith.subf %4, %3 : vector<1x2048xf32>
    %6 = math.exp %5 : vector<1x2048xf32>
    %7 = math.log1p %6 : vector<1x2048xf32>
    %cst_5 = arith.constant 0.000000e+00 : f32
    %8 = vector.broadcast %cst_5 : f32 to vector<1x2048xf32>
    %9 = arith.minimumf %0, %8 : vector<1x2048xf32>
    %10 = arith.subf %9, %7 : vector<1x2048xf32>
    %cst_6 = arith.constant 0.000000e+00 : f32
    %11 = vector.broadcast %cst_6 : f32 to vector<1x2048xf32>
    %12 = arith.subf %11, %0 : vector<1x2048xf32>
    %cst_7 = arith.constant 0.000000e+00 : f32
    %13 = vector.broadcast %cst_7 : f32 to vector<1x2048xf32>
    %14 = arith.minimumf %12, %13 : vector<1x2048xf32>
    %15 = arith.subf %14, %7 : vector<1x2048xf32>
    %cst_8 = arith.constant 1.000000e+00 : f32
    %16 = vector.broadcast %cst_8 : f32 to vector<1x2048xf32>
    %17 = arith.addf %16, %6 : vector<1x2048xf32>
    %cst_9 = arith.constant 1.000000e+00 : f32
    %18 = vector.broadcast %cst_9 : f32 to vector<1x2048xf32>
    %19 = arith.divf %18, %17 : vector<1x2048xf32>
    %cst_10 = arith.constant 0.000000e+00 : f32
    %20 = vector.broadcast %cst_10 : f32 to vector<1x2048xf32>
    %21 = arith.cmpf oge, %0, %20 : vector<1x2048xf32>
    %22 = arith.mulf %6, %19 : vector<1x2048xf32>
    %23 = arith.select %21, %19, %22 : vector<1x2048xi1>, vector<1x2048xf32>
    %24 = arith.mulf %6, %19 : vector<1x2048xf32>
    %25 = arith.select %21, %24, %19 : vector<1x2048xi1>, vector<1x2048xf32>
    %26 = arith.mulf %25, %25 : vector<1x2048xf32>
    %27 = arith.mulf %23, %23 : vector<1x2048xf32>
    %cst_11 = arith.constant -2.500000e-01 : f32
    %28 = vector.broadcast %cst_11 : f32 to vector<1x2048xf32>
    %29 = arith.mulf %28, %2 : vector<1x2048xf32>
    %30 = arith.mulf %29, %26 : vector<1x2048xf32>
    %31 = arith.mulf %30, %1 : vector<1x2048xf32>
    %32 = arith.mulf %31, %10 : vector<1x2048xf32>
    %cst_12 = arith.constant 7.500000e-01 : f32
    %33 = vector.broadcast %cst_12 : f32 to vector<1x2048xf32>
    %34 = arith.mulf %33, %27 : vector<1x2048xf32>
    %cst_13 = arith.constant 1.000000e+00 : f32
    %35 = vector.broadcast %cst_13 : f32 to vector<1x2048xf32>
    %36 = arith.subf %35, %1 : vector<1x2048xf32>
    %37 = arith.mulf %34, %36 : vector<1x2048xf32>
    %38 = arith.mulf %37, %15 : vector<1x2048xf32>
    %39 = arith.subf %32, %38 : vector<1x2048xf32>
    %c0_14 = arith.constant 0 : index
    %c0_15 = arith.constant 0 : index
    %40 = vector.load %arg4[%c0_14, %c0_15] : memref<1x2048xf32, #tpu.memory_space<vmem>>, vector<1x2048xf32>
    tpu.vector_store %arg4[%c0_14, %c0_15], %39 {strides = array<i32>} : memref<1x2048xf32, #tpu.memory_space<vmem>>, vector<1x2048xf32>,
    return
  }
  func.func @transform_0(%arg0: i32) -> (i32, i32) {
    %c0_i32 = arith.constant 0 : i32
    %c0_i32_0 = arith.constant 0 : i32
    return %arg0, %c0_i32 : i32, i32
  }
  func.func @transform_1(%arg0: i32) -> (i32, i32) {
    %c0_i32 = arith.constant 0 : i32
    %c0_i32_0 = arith.constant 0 : i32
    return %arg0, %c0_i32 : i32, i32
  }
  func.func @transform_2(%arg0: i32) -> (i32, i32) {
    %c0_i32 = arith.constant 0 : i32
    %c0_i32_0 = arith.constant 0 : i32
    %c0_i32_1 = arith.constant 0 : i32
    return %c0_i32, %c0_i32_0 : i32, i32
  }
  func.func @transform_3(%arg0: i32) -> (i32, i32) {
    %c0_i32 = arith.constant 0 : i32
    %c0_i32_0 = arith.constant 0 : i32
    return %arg0, %c0_i32 : i32, i32
  }
}

</mosaic_0001>

<bundles_post_ra>
// kernel: tpu_custom_call.1
= control target key start
LH: loop header
LB: loop body
LE: loop exit
PB: predicated region body
PF: predicated region fallthrough
CT: control target
= control target key end

     0   :  { %8 = vsyncpa [#allocation3], 0  ;;  %s334_s0 = inlined_call_operand.hbm [shape: f32[1,2048], index: 0, kind: input, shape index: {}]   ;;  %s335_s1 = inlined_call_operand.hbm [shape: f32[1,2048], index: 1, kind: input, shape index: {}]   ;;  %s336_s2 = inlined_call_operand.hbm [shape: f32[1,2048], index: 2, kind: input, shape index: {}]   ;;  %s337_s3 = inlined_call_operand.hbm [shape: f32[1,2048], index: 3, kind: output, shape index: {}]  }
   0x1   :  { %9 = vsyncpa [#allocation6], 0 }
   0x2   :  { %10 = vsyncpa [#allocation4], 0  ;;  %s256_s12 = smov [#allocation5]   ;;  %s257_s14 = smov [#allocation2]  }
   0x3   :  { %s27_s13 = sshll.u32 %s256_s12, 4  ;;  %s17_s15 = sshll.u32 %s257_s14, 4  ;;  %s28_s13 = int_to_ptr.vmem [resolvable:$true] %s27_s13  ;;  %s18_s15 = int_to_ptr.vmem [resolvable:$true] %s17_s15 }
   0x4   :  { %s162_s18 = scalar_lea.hbm %s335_s1, 256 }
   0x5   :  { %p163_p0 = scmp.ne.s32.totalorder %s335_s1, %s162_s18  ;;  %p166_p1 = scmp.lt.u32.totalorder %s162_s18, %s335_s1 }
   0x7   :  { %p168_p2 = pnand %p166_p1, %p163_p0 }
   0x9   :  { %171 = shalt.err (!%p168_p2)
}
   0xa   :  { %s172_s23 = scalar_lea.vmem %s28_s13, 256  ;;  %p177_p4 = scmp.lt.s32.totalorder %s28_s13, %s28_s13 }
   0xb   :  { %p173_p3 = scmp.ne.s32.totalorder %s28_s13, %s172_s23  ;;  %p178_p5 = scmp.lt.s32.totalorder %s172_s23, %s172_s23 }
   0xd   :  { %p179_p6 = por %p178_p5, %p177_p4 }
   0xf   :  { %p180_p7 = pnand %p179_p6, %p173_p3 }
  0x11   :  { %183 = shalt.err (!%p180_p7)
}
  0x12   :  { %30 = dma.hbm_to_vmem [thread:$0]  %s335_s1, 256, %s28_s13, [#allocation6]  }
  0x13   :  { %s184_s28 = scalar_lea.hbm %s334_s0, 256 }
  0x14   :  { %p185_p8 = scmp.ne.s32.totalorder %s334_s0, %s184_s28  ;;  %p188_p9 = scmp.lt.u32.totalorder %s184_s28, %s334_s0 }
  0x16   :  { %p190_p10 = pnand %p188_p9, %p185_p8 }
  0x18   :  { %193 = shalt.err (!%p190_p10)
}
  0x19   :  { %s194_s6 = scalar_lea.vmem %s18_s15, 256  ;;  %p199_p12 = scmp.lt.s32.totalorder %s18_s15, %s18_s15 }
  0x1a   :  { %p195_p11 = scmp.ne.s32.totalorder %s18_s15, %s194_s6  ;;  %p200_p13 = scmp.lt.s32.totalorder %s194_s6, %s194_s6 }
  0x1c   :  { %p201_p0 = por %p200_p13, %p199_p12 }
  0x1e   :  { %p202_p1 = pnand %p201_p0, %p195_p11 }
  0x20   :  { %205 = shalt.err (!%p202_p1)
}
  0x21   :  { %20 = dma.hbm_to_vmem [thread:$0]  %s334_s0, 256, %s18_s15, [#allocation3]  }
  0x22   :  { %s258_s8 = smov [#allocation7]   ;;  %s206_s12 = scalar_lea.hbm %s336_s2, 256 }
  0x23   :  { %s37_s9 = sshll.u32 %s258_s8, 4  ;;  %p207_p2 = scmp.ne.s32.totalorder %s336_s2, %s206_s12  ;;  %s38_s9 = int_to_ptr.vmem [resolvable:$true] %s37_s9 }
  0x24   :  { %p210_p3 = scmp.lt.u32.totalorder %s206_s12, %s336_s2 }
  0x26   :  { %p212_p4 = pnand %p210_p3, %p207_p2 }
  0x28   :  { %215 = shalt.err (!%p212_p4)
}
  0x29   :  { %s216_s18 = scalar_lea.vmem %s38_s9, 256  ;;  %p221_p6 = scmp.lt.s32.totalorder %s38_s9, %s38_s9 }
  0x2a   :  { %p217_p5 = scmp.ne.s32.totalorder %s38_s9, %s216_s18  ;;  %p222_p7 = scmp.lt.s32.totalorder %s216_s18, %s216_s18 }
  0x2c   :  { %p223_p8 = por %p222_p7, %p221_p6 }
  0x2e   :  { %p224_p9 = pnand %p223_p8, %p217_p5 }
  0x30   :  { %227 = shalt.err (!%p224_p9)
}
  0x31   :  { %40 = dma.hbm_to_vmem [thread:$0]  %s336_s2, 256, %s38_s9, [#allocation6]  }
  0x32   :  { %250 = dma.done.wait [#allocation3], 256  }
  0x33   :  { %251 = vsyncadd [#allocation3], 4294967040 }
  0x34   :  { %252 = dma.done.wait [#allocation6], 512  }
  0x35   :  { %253 = vsyncadd [#allocation6], 4294966784  ;;  %v50_v0 = vld [vmem:[#allocation2] sm:$0xff]  ;;  %v316_v2 = vld [vmem:[#allocation2 + $0x8] sm:$0xff]  ;;  %s259_s2 = smov [#allocation8]  }
  0x36   :  { %v56_v1 = vand.u32 2147483647, %v50_v0  ;;  %v57_v3 = vand.u32 2147483647, %v316_v2  ;;  %v54_v16 = vld [vmem:[#allocation7] sm:$0xff]  ;;  %v86_v17 = vsub.f32 0.0, %v50_v0 }
  0x37   :  { %v52_v22 = vld [vmem:[#allocation5] sm:$0xff]  ;;  %v82_v25 = vmin.f32 %v50_v0, 0.0  ;;  %vm98_vm1 = vcmp.ge.f32.partialorder %v50_v0, 0.0  ;;  %v110_v26 = vmul.f32 -0.25, %v54_v16  ;;  %v55_v30 = vld [vmem:[#allocation7 + $0x8] sm:$0xff]  ;;  %v87_v32 = vsub.f32 0.0, %v316_v2 }
  0x38   :  { %v58_v4 = vsub.f32 0.0, %v56_v1  ;;  %v59_v5 = vsub.f32 0.0, %v57_v3  ;;  %v88_v28 = vmin.f32 %v86_v17, 0.0  ;;  %v120_v35 = vsub.f32 1.0, %v52_v22  ;;  %v53_v42 = vld [vmem:[#allocation5 + $0x8] sm:$0xff]  ;;  %s136_s19 = sshll.u32 %s259_s2, 4  ;;  %s137_s19 = int_to_ptr.vmem [resolvable:$true] %s136_s19 }
  0x39   :  { %v83_v39 = vmin.f32 %v316_v2, 0.0  ;;  %vm99_vm3 = vcmp.ge.f32.partialorder %v316_v2, 0.0  ;;  %v111_v44 = vmul.f32 -0.25, %v55_v30  ;;  %v89_v48 = vmin.f32 %v87_v32, 0.0  ;;  %s228_s20 = scalar_lea.vmem %s137_s19, 256  ;;  %p233_p11 = scmp.lt.s32.totalorder %s137_s19, %s137_s19 }
  0x3a   :  { %v60_v6 = vmul.f32 1.442695, %v58_v4  ;;  %v62_v7 = vmul.f32 1.442695, %v59_v5  ;;  %v121_v55 = vsub.f32 1.0, %v53_v42  ;;  %p229_p10 = scmp.ne.s32.totalorder %s137_s19, %s228_s20  ;;  %p234_p12 = scmp.lt.s32.totalorder %s228_s20, %s228_s20 }
  0x3c   :  { %150 = vpow2.f32 %v60_v6  ;;  %p235_p13 = por %p234_p12, %p233_p11 }
  0x3d   :  { %152 = vpow2.f32 %v62_v7 }
  0x3e   :  { %p236_p0 = pnand %p235_p13, %p229_p10 }
  0x46   :  { %v151_v8 = vpop.eup %150 }
  0x47   :  { %v153_v9 = vpop.eup %152  ;;  %v64_v10 = vadd.f32 1.0, %v151_v8  ;;  %v67_v12 = vmul.f32 -0.5, %v151_v8  ;;  %v70_v15 = vand.u32 2147483647, %v151_v8 }
  0x48   :  { %v73_v11 = vadd.f32 1.0, %v153_v9  ;;  %v76_v13 = vmul.f32 -0.5, %v153_v9  ;;  %v79_v20 = vand.u32 2147483647, %v153_v9 }
  0x49   :  { %154 = vlog2.f32 %v64_v10  ;;  %v68_v14 = vadd.f32 1.0, %v67_v12  ;;  %vm71_vm0 = vcmp.lt.f32.partialorder %v70_v15, 0.0004427343 }
  0x4a   :  { %156 = vrcp.f32 %v64_v10  ;;  %v77_v18 = vadd.f32 1.0, %v76_v13  ;;  %vm80_vm2 = vcmp.lt.f32.partialorder %v79_v20, 0.0004427343 }
  0x4b   :  { %158 = vlog2.f32 %v73_v11  ;;  %v69_v19 = vmul.f32 %v151_v8, %v68_v14 }
  0x4c   :  { %160 = vrcp.f32 %v73_v11  ;;  %v78_v31 = vmul.f32 %v153_v9, %v77_v18 }
  0x53   :  { %v155_v21 = vpop.eup %154 }
  0x54   :  { %v157_v23 = vpop.eup %156  ;;  %v66_v24 = vmul.f32 0.6931472, %v155_v21 }
  0x55   :  { %v159_v27 = vpop.eup %158  ;;  %v100_v29 = vmul.f32 %v157_v23, %v151_v8 }
  0x56   :  { %v161_v33 = vpop.eup %160  ;;  %v72_v34 = vsel %vm71_vm0, %v69_v19, %v66_v24  ;;  %v75_v36 = vmul.f32 0.6931472, %v159_v27 }
  0x57   :  { %v102_v37 = vsel %vm98_vm1, %v157_v23, %v100_v29  ;;  %v104_v38 = vsel %vm98_vm1, %v100_v29, %v157_v23  ;;  %v101_v43 = vmul.f32 %v161_v33, %v153_v9  ;;  %v84_v45 = vsub.f32 %v82_v25, %v72_v34 }
  0x58   :  { %v106_v40 = vmul.f32 %v104_v38, %v104_v38  ;;  %v108_v41 = vmul.f32 %v102_v37, %v102_v37  ;;  %v90_v46 = vsub.f32 %v88_v28, %v72_v34  ;;  %v81_v47 = vsel %vm80_vm2, %v78_v31, %v75_v36 }
  0x59   :  { %v103_v51 = vsel %vm99_vm3, %v161_v33, %v101_v43  ;;  %v105_v52 = vsel %vm99_vm3, %v101_v43, %v161_v33  ;;  %v85_v58 = vsub.f32 %v83_v39, %v81_v47  ;;  %v91_v59 = vsub.f32 %v89_v48, %v81_v47 }
  0x5a   :  { %v112_v49 = vmul.f32 %v110_v26, %v106_v40  ;;  %v118_v50 = vmul.f32 0.75, %v108_v41  ;;  %v107_v53 = vmul.f32 %v105_v52, %v105_v52  ;;  %v109_v54 = vmul.f32 %v103_v51, %v103_v51 }
  0x5c   :  { %v114_v56 = vmul.f32 %v112_v49, %v52_v22  ;;  %v122_v57 = vmul.f32 %v120_v35, %v118_v50  ;;  %v113_v60 = vmul.f32 %v111_v44, %v107_v53  ;;  %v119_v61 = vmul.f32 0.75, %v109_v54 }
  0x5e   :  { %v116_v62 = vmul.f32 %v114_v56, %v84_v45  ;;  %v124_v63 = vmul.f32 %v122_v57, %v90_v46  ;;  %v115_v0 = vmul.f32 %v113_v60, %v53_v42  ;;  %v123_v1 = vmul.f32 %v121_v55, %v119_v61 }
  0x60   :  { %v126_v2 = vsub.f32 %v116_v62, %v124_v63  ;;  %v117_v3 = vmul.f32 %v115_v0, %v85_v58  ;;  %v125_v4 = vmul.f32 %v123_v1, %v91_v59 }
  0x62   :  { %128 = vst [vmem:[#allocation8] sm:$0xff] %v126_v2  ;;  %v127_v5 = vsub.f32 %v117_v3, %v125_v4 }
  0x64   :  { %129 = vst [vmem:[#allocation8 + $0x8] sm:$0xff] %v127_v5 }
  0x65   :  { %239 = shalt.err (!%p236_p0)
}
  0x66   :  { %s240_s23 = scalar_lea.hbm %s337_s3, 256 }
  0x67   :  { %p241_p1 = scmp.ne.s32.totalorder %s337_s3, %s240_s23  ;;  %p244_p2 = scmp.lt.u32.totalorder %s240_s23, %s337_s3 }
  0x69   :  { %p246_p3 = pnand %p244_p2, %p241_p1 }
  0x6b   :  { %249 = shalt.err (!%p246_p3)
}
  0x6c   :  { %139 = dma.vmem_to_hbm [thread:$0]  %s137_s19, 256, %s337_s3, [#allocation4]  }
  0x6d   :  { %254 = dma.done.wait [#allocation4], 256  }
  0x6e   :  { %255 = vsyncadd [#allocation4], 4294967040 }
  0x6f   :  { %143 = vsyncpa [#allocation3], 1 }
  0x70   :  { %144 = vsyncpa [#allocation6], 1 }
  0x71   :  { %145 = vsyncpa [#allocation4], 1 }

</bundles_post_ra>
